<compile_context>
chip_gen: v6e
topology: v6e:2x2x1
jax: 0.10.0
libtpu: 0.0.40
codegen_flags: <defaults>
</compile_context>

<pallas_src>
import functools
import math

import jax
import jax.numpy as jnp
import numpy as np
from jax.experimental import pallas as pl
from jax.experimental.pallas import tpu as pltpu


_LIMB = [[6, 2], [6, 3], [6, 7], [2, 1], [1, 0], [3, 4], [4, 5],
         [7, 10], [7, 11], [7, 14], [10, 9], [9, 8], [11, 12], [12, 13]]
_NODE0 = np.array([a for a, b in _LIMB], dtype=np.int32)   # subtrahend joint
_NODE1 = np.array([b for a, b in _LIMB], dtype=np.int32)   # minuend joint

_LANE = 128
_MAX_TC = 65536          # lane tile; see VMEM budget in header comment
_MIN_PALLAS_ELEMS = 4096  # below this, the fused XLA reference is faster


def _round_up(x, m):
    return ((x + m - 1) // m) * m


def _limb_dir_l2_kernel(stk_ref, out_ref, acc_ref, *, n_valid, n_total):
    i = pl.program_id(0)

    @pl.when(i == 0)
    def _init():
        acc_ref[...] = jnp.zeros_like(acc_ref)

    # Single stacked (9, TC) block: rows 0:3 = kp1, 3:6 = kp0, 6:9 = dir.
    kp1 = stk_ref[0:3, :].astype(jnp.float32)                   # (3, TC)
    kp0 = stk_ref[3:6, :].astype(jnp.float32)                   # (3, TC)
    d = stk_ref[6:9, :].astype(jnp.float32)                     # (3, TC)

    limbs = kp1 - kp0                                           # (3, TC)
    dot = jnp.sum(limbs * d, axis=0, keepdims=True)             # (1, TC)
    resid = limbs - dot * d                                     # (3, TC)
    sq = jnp.sum(resid * resid, axis=0, keepdims=True)          # (1, TC)
    # Padded lanes are exactly zero -> contribute exactly sqrt(1e-13) each;
    # corrected once in the finalize instead of masking every step.
    acc_ref[...] += jnp.sqrt(sq + jnp.float32(1e-13))           # (1, TC)

    @pl.when(i == pl.num_programs(0) - 1)
    def _finalize():
        total = jnp.sum(acc_ref[...], axis=(0, 1), keepdims=True)
        pad_corr = jnp.float32((n_total - n_valid) * math.sqrt(1e-13))
        out_ref[...] = (total - pad_corr) / jnp.float32(n_valid)


def _reference_loss(keypoints_pred, limb_directions_pred):
    limbs = keypoints_pred[:, _NODE1, :] - keypoints_pred[:, _NODE0, :]
    proj = (jnp.sum(limbs * limb_directions_pred, axis=-1, keepdims=True)
            * limb_directions_pred)
    return jnp.mean(jnp.sqrt(jnp.sum((limbs - proj) ** 2, axis=-1) + 1e-13))


def limb_dir_l2_loss(keypoints_pred, limb_directions_pred, *,
                     force_pallas=False):
    """Pallas implementation of LimbDirL2Loss.forward."""
    batch, n_joints, dim = keypoints_pred.shape
    assert dim == 3, "LimbDirL2Loss expects 3-D keypoints"
    limb_len = len(_LIMB)
    assert limb_directions_pred.shape == (batch, limb_len, 3)

    n = batch * limb_len
    if n < _MIN_PALLAS_ELEMS and not force_pallas:
        # Launch + layout plumbing dominate a tiny problem; use fused XLA.
        return _reference_loss(keypoints_pred, limb_directions_pred)

    # Static (constant-index) gather of limb endpoints — layout plumbing only;
    # all arithmetic happens inside the kernel.
    kp1 = keypoints_pred[:, _NODE1, :]       # (B, L, 3)
    kp0 = keypoints_pred[:, _NODE0, :]       # (B, L, 3)

    tc = min(_MAX_TC, _round_up(n, _LANE))
    n_pad = _round_up(n, tc)
    grid = (n_pad // tc,)

    # Native (promoted) dtype — no wrapper-side f32 upcast.
    dtype = jnp.result_type(keypoints_pred.dtype, limb_directions_pred.dtype)

    def lane_dense(x):
        # (B, L, 3) -> (3, B*L), zero-padded on the lane axis to n_pad.
        x2 = x.reshape(n, 3).T.astype(dtype)
        return jnp.pad(x2, ((0, 0), (0, n_pad - n)))

    stacked = jnp.concatenate(
        [lane_dense(kp1), lane_dense(kp0), lane_dense(limb_directions_pred)],
        axis=0)                                                # (9, n_pad)

    kernel = functools.partial(_limb_dir_l2_kernel, n_valid=n, n_total=n_pad)
    itemsize = jnp.dtype(dtype).itemsize

    loss = pl.pallas_call(
        kernel,
        out_shape=jax.ShapeDtypeStruct((1, 1), jnp.float32),
        grid=grid,
        in_specs=[pl.BlockSpec((9, tc), lambda i: (0, i))],
        out_specs=pl.BlockSpec((1, 1), lambda i: (0, 0)),
        scratch_shapes=[pltpu.VMEM((1, tc), jnp.float32)],
        compiler_params=pltpu.CompilerParams(
            dimension_semantics=("arbitrary",),
            vmem_limit_bytes=32 * 1024 * 1024,
        ),
        cost_estimate=pl.CostEstimate(
            flops=20 * n,
            transcendentals=n_pad,
            bytes_accessed=9 * n_pad * itemsize + 4,
        ),
    )(stacked)

    return loss[0, 0]


if __name__ == "__main__":
    key = jax.random.PRNGKey(0)
    k1, k2 = jax.random.split(key)

    # Small demo shapes (joint indices 0..14 are used by the limb table).
    batch, n_joints = 2, 17
    keypoints_pred = jax.random.normal(k1, (batch, n_joints, 3),
                                       dtype=jnp.float32)
    limb_directions_pred = jax.random.normal(k2, (batch, len(_LIMB), 3),
                                             dtype=jnp.float32)
    limb_directions_pred = limb_directions_pred / jnp.linalg.norm(
        limb_directions_pred, axis=-1, keepdims=True)

    # Force the Pallas path even at this tiny size so the kernel is exercised.
    loss = limb_dir_l2_loss(keypoints_pred, limb_directions_pred,
                            force_pallas=True)
    loss = jax.block_until_ready(loss)
    ref = _reference_loss(keypoints_pred, limb_directions_pred)
    assert jnp.allclose(loss, ref, rtol=1e-5, atol=1e-6), (loss, ref)

    # A second, larger problem that uses the Pallas path on its own merits
    # (single grid step, single DMA stream).
    k3, k4 = jax.random.split(k2)
    batch2 = 512
    kp2 = jax.random.normal(k3, (batch2, n_joints, 3), dtype=jnp.float32)
    dir2 = jax.random.normal(k4, (batch2, len(_LIMB), 3), dtype=jnp.float32)
    dir2 = dir2 / jnp.linalg.norm(dir2, axis=-1, keepdims=True)

    loss2 = jax.block_until_ready(limb_dir_l2_loss(kp2, dir2))
    ref2 = _reference_loss(kp2, dir2)
    assert jnp.allclose(loss2, ref2, rtol=1e-5, atol=1e-6), (loss2, ref2)

    print("KERNEL_OK")
</pallas_src>

<mosaic_0001>
module attributes {stable_mosaic.version = 11 : i64} {
  func.func @_limb_dir_l2_kernel(%arg0: i32, %arg1: memref<9x128xf32, #tpu.memory_space<vmem>>, %arg2: memref<1x1xf32, #tpu.memory_space<vmem>>, %arg3: memref<1x128xf32, #tpu.memory_space<vmem>>) attributes {dimension_semantics = [#tpu.dimension_semantics<arbitrary>], iteration_bounds = array<i64: 1>, scalar_prefetch = 0 : i64, scratch_operands = 1 : i64, tpu.core_type = #tpu.core_type<tc>, window_params = [{transform_indices = @transform_0, window_bounds = array<i64: 9, 128>}, {pipeline_mode = #tpu.pipeline_mode<synchronous>, transform_indices = @transform_1, window_bounds = array<i64: 1, 1>}]} {
    %c0_i32 = arith.constant 0 : i32
    %0 = arith.cmpi eq, %arg0, %c0_i32 : i32
    %1 = arith.extui %0 : i1 to i32
    %c0_i32_0 = arith.constant 0 : i32
    %2 = arith.cmpi ne, %1, %c0_i32_0 : i32
    scf.if %2 {
      %cst_12 = arith.constant 0.000000e+00 : f32
      %25 = vector.broadcast %cst_12 : f32 to vector<1x128xf32>
      %c0_13 = arith.constant 0 : index
      %c0_14 = arith.constant 0 : index
      %26 = vector.load %arg3[%c0_13, %c0_14] : memref<1x128xf32, #tpu.memory_space<vmem>>, vector<1x128xf32>
      tpu.vector_store %arg3[%c0_13, %c0_14], %25 {strides = array<i32>} : memref<1x128xf32, #tpu.memory_space<vmem>>, vector<1x128xf32>,
    } else {
    }
    %c0 = arith.constant 0 : index
    %c0_1 = arith.constant 0 : index
    %3 = vector.load %arg1[%c0, %c0_1] : memref<9x128xf32, #tpu.memory_space<vmem>>, vector<3x128xf32>
    %c3 = arith.constant 3 : index
    %c0_2 = arith.constant 0 : index
    %4 = vector.load %arg1[%c3, %c0_2] : memref<9x128xf32, #tpu.memory_space<vmem>>, vector<3x128xf32>
    %c6 = arith.constant 6 : index
    %c0_3 = arith.constant 0 : index
    %5 = vector.load %arg1[%c6, %c0_3] : memref<9x128xf32, #tpu.memory_space<vmem>>, vector<3x128xf32>
    %6 = arith.subf %3, %4 : vector<3x128xf32>
    %7 = arith.mulf %6, %5 : vector<3x128xf32>
    %cst = arith.constant dense<0.000000e+00> : vector<128xf32>
    %8 = vector.multi_reduction <add>, %7, %cst [0] : vector<3x128xf32> to vector<128xf32>
    %9 = vector.shape_cast %8 : vector<128xf32> to vector<1x128xf32>
    %10 = vector.broadcast %9 : vector<1x128xf32> to vector<3x128xf32>
    %11 = arith.mulf %10, %5 : vector<3x128xf32>
    %12 = arith.subf %6, %11 : vector<3x128xf32>
    %13 = arith.mulf %12, %12 : vector<3x128xf32>
    %cst_4 = arith.constant dense<0.000000e+00> : vector<128xf32>
    %14 = vector.multi_reduction <add>, %13, %cst_4 [0] : vector<3x128xf32> to vector<128xf32>
    %15 = vector.shape_cast %14 : vector<128xf32> to vector<1x128xf32>
    %c0_5 = arith.constant 0 : index
    %c0_6 = arith.constant 0 : index
    %16 = vector.load %arg3[%c0_5, %c0_6] : memref<1x128xf32, #tpu.memory_space<vmem>>, vector<1x128xf32>
    %cst_7 = arith.constant 9.99999982E-14 : f32
    %17 = vector.broadcast %cst_7 : f32 to vector<1x128xf32>
    %18 = arith.addf %15, %17 : vector<1x128xf32>
    %19 = math.sqrt %18 : vector<1x128xf32>
    %20 = arith.addf %16, %19 : vector<1x128xf32>
    %c0_8 = arith.constant 0 : index
    %c0_9 = arith.constant 0 : index
    %21 = vector.load %arg3[%c0_8, %c0_9] : memref<1x128xf32, #tpu.memory_space<vmem>>, vector<1x128xf32>
    tpu.vector_store %arg3[%c0_8, %c0_9], %20 {strides = array<i32>} : memref<1x128xf32, #tpu.memory_space<vmem>>, vector<1x128xf32>,
    %c0_i32_10 = arith.constant 0 : i32
    %22 = arith.cmpi eq, %arg0, %c0_i32_10 : i32
    %23 = arith.extui %22 : i1 to i32
    %c0_i32_11 = arith.constant 0 : i32
    %24 = arith.cmpi ne, %23, %c0_i32_11 : i32
    scf.if %24 {
      %c0_12 = arith.constant 0 : index
      %c0_13 = arith.constant 0 : index
      %25 = vector.load %arg3[%c0_12, %c0_13] : memref<1x128xf32, #tpu.memory_space<vmem>>, vector<1x128xf32>
      %26 = vector.shape_cast %25 : vector<1x128xf32> to vector<1x1x128xf32>
      %cst_14 = arith.constant dense<0.000000e+00> : vector<1xf32>
      %27 = vector.multi_reduction <add>, %26, %cst_14 [1, 2] : vector<1x1x128xf32> to vector<1xf32>
      %28 = vector.shape_cast %27 : vector<1xf32> to vector<1x1x1xf32>
      %29 = vector.extract %28[0, 0, 0] : f32 from vector<1x1x1xf32>
      %30 = vector.broadcast %29 : f32 to vector<1x1xf32>
      %cst_15 = arith.constant 3.16227779E-5 : f32
      %31 = vector.broadcast %cst_15 : f32 to vector<1x1xf32>
      %32 = arith.subf %30, %31 : vector<1x1xf32>
      %cst_16 = arith.constant 2.800000e+01 : f32
      %33 = vector.broadcast %cst_16 : f32 to vector<1x1xf32>
      %34 = arith.divf %32, %33 : vector<1x1xf32>
      %c0_17 = arith.constant 0 : index
      %c0_18 = arith.constant 0 : index
      %35 = vector.load %arg2[%c0_17, %c0_18] : memref<1x1xf32, #tpu.memory_space<vmem>>, vector<1x1xf32>
      tpu.vector_store %arg2[%c0_17, %c0_18], %34 {strides = array<i32>} : memref<1x1xf32, #tpu.memory_space<vmem>>, vector<1x1xf32>,
    } else {
    }
    return
  }
  func.func @transform_0(%arg0: i32) -> (i32, i32) {
    %c0_i32 = arith.constant 0 : i32
    %c0_i32_0 = arith.constant 0 : i32
    return %c0_i32, %arg0 : i32, i32
  }
  func.func @transform_1(%arg0: i32) -> (i32, i32) {
    %c0_i32 = arith.constant 0 : i32
    %c0_i32_0 = arith.constant 0 : i32
    %c0_i32_1 = arith.constant 0 : i32
    return %c0_i32, %c0_i32_0 : i32, i32
  }
}

</mosaic_0001>

<bundles_post_ra>
// kernel: tpu_custom_call.1
= control target key start
LH: loop header
LB: loop body
LE: loop exit
PB: predicated region body
PF: predicated region fallthrough
CT: control target
= control target key end

     0   :  { %6 = vsyncpa [#allocation4], 0  ;;  %s173_s0 = inlined_call_operand.hbm [shape: f32[9,128], index: 0, kind: input, shape index: {}]   ;;  %s174_s1 = inlined_call_operand.hbm [shape: f32[1,1], index: 1, kind: output, shape index: {}]  }
   0x1   :  { %7 = vsyncpa [#allocation5], 0  ;;  %s152_s6 = smov [#allocation3]  }
   0x2   :  { %s13_s7 = sshll.u32 %s152_s6, 4  ;;  %s14_s7 = int_to_ptr.vmem [resolvable:$true] %s13_s7 }
   0x3   :  { %s116_s8 = scalar_lea.vmem %s14_s7, 256  ;;  %p121_p1 = scmp.lt.s32.totalorder %s14_s7, %s14_s7 }
   0x4   :  { %p117_p0 = scmp.ne.s32.totalorder %s14_s7, %s116_s8  ;;  %p122_p2 = scmp.lt.s32.totalorder %s116_s8, %s116_s8 }
   0x6   :  { %p123_p3 = por %p122_p2, %p121_p1 }
   0x8   :  { %p124_p4 = pnand %p123_p3, %p117_p0 }
   0xa   :  { %127 = shalt.err (!%p124_p4)
}
   0xb   :  { %s153_s9 = smov 128   ;;  %s154_s10 = smov 8  }
   0xc   :  { %19 = dma.hbm_to_vmem [thread:$0]  %s173_s0, 256, %s14_s7, [#allocation4], %s153_s9, %s153_s9, %s154_s10  }
   0xd   :  { %148 = dma.done.wait [#allocation4], 256  }
   0xe   :  { %149 = vsyncadd [#allocation4], 4294967040  ;;  %v155_v0 = vmov 0.0   ;;  %v28_v1 = vld [vmem:[#allocation3] sm:$0x7]  ;;  %vm33_vm0 = vcmask 1042432  }
   0xf   :  { %27 = vst [vmem:[#allocation2] sm:$0x1] %v155_v0  ;;  %v29_v2 = vld [vmem:[#allocation3 + $0x3] sm:$0x7]  ;;  %v30_v3 = vld [vmem:[#allocation3 + $0x6] sm:$0x7] }
  0x10   :  { %v31_v4 = vsub.f32 %v28_v1, %v29_v2  ;;  %vm66_vm3 = vcmask 1040384   ;;  %s156_s13 = smov [#allocation6]   ;;  %vm81_vm4 = vcmask 0  }
  0x11   :  { %s89_s14 = sshll.u32 %s156_s13, 4  ;;  %s90_s14 = int_to_ptr.vmem [resolvable:$true] %s89_s14 }
  0x12   :  { %v32_v5 = vmul.f32 %v31_v4, %v30_v3  ;;  %s128_s15 = scalar_lea.vmem %s90_s14, 16  ;;  %s132_s16 = scalar_lea.vmem %s90_s14, 32 }
  0x13   :  { %p129_p5 = scmp.ne.s32.totalorder %s90_s14, %s128_s15  ;;  %p133_p6 = scmp.lt.s32.totalorder %s90_s14, %s90_s14 }
  0x14   :  { %v34_v6 = vsel %vm33_vm0, %v32_v5, 0.0  ;;  %p134_p7 = scmp.lt.s32.totalorder %s132_s16, %s128_s15 }
  0x15   :  { %v35_v7 = vrot.slane %v34_v6, 4 }
  0x16   :  { %v51_v27 = vld [vmem:[#allocation2] sm:$0x1]  ;;  %p135_p8 = por %p134_p7, %p133_p6 }
  0x17   :  { %v36_v8 = vadd.f32 %v35_v7, %v34_v6 }
  0x18   :  { %p136_p9 = pnand %p135_p8, %p129_p5 }
  0x19   :  { %v37_v9 = vrot.slane %v36_v8, 2 }
  0x1b   :  { %v38_v10 = vadd.f32 %v37_v9, %v36_v8 }
  0x1d   :  { %v39_v11 = vrot.slane %v38_v10, 1 }
  0x1f   :  { %v40_v12 = vadd.f32 %v39_v11, %v38_v10 }
  0x21   :  { %v41_v13 = vmul.f32 %v40_v12, %v30_v3 }
  0x23   :  { %v42_v14 = vsub.f32 %v31_v4, %v41_v13 }
  0x25   :  { %v43_v15 = vmul.f32 %v42_v14, %v42_v14 }
  0x27   :  { %v44_v16 = vsel %vm33_vm0, %v43_v15, 0.0 }
  0x28   :  { %v45_v17 = vrot.slane %v44_v16, 4 }
  0x2a   :  { %v46_v18 = vadd.f32 %v45_v17, %v44_v16 }
  0x2c   :  { %v47_v19 = vrot.slane %v46_v18, 2 }
  0x2e   :  { %v48_v20 = vadd.f32 %v47_v19, %v46_v18 }
  0x30   :  { %v49_v21 = vrot.slane %v48_v20, 1 }
  0x32   :  { %v50_v22 = vadd.f32 %v49_v21, %v48_v20 }
  0x34   :  { %v52_v23 = vadd.f32 1e-13, %v50_v22 }
  0x36   :  { %106 = vrsqrt.f32 %v52_v23  ;;  %vm55_vm1 = vcmp.eq.f32.partialorder %v52_v23, inf  ;;  %v58_v25 = vand.u32 2147483648, %v52_v23  ;;  %vm57_vm2 = vcmp.eq.f32.partialorder %v52_v23, 0.0 }
  0x43   :  { %v107_v24 = vpop.eup %106 }
  0x44   :  { %v54_v26 = vmul.f32 %v107_v24, %v52_v23 }
  0x46   :  { %v56_v28 = vsel %vm55_vm1, %v52_v23, %v54_v26 }
  0x47   :  { %v59_v29 = vsel %vm57_vm2, %v58_v25, %v56_v28 }
  0x48   :  { %v60_v30 = vadd.f32 %v59_v29, %v51_v27 }
  0x4a   :  { %61 = vst [vmem:[#allocation2] sm:$0x1] %v60_v30 }
  0x51   :  { %v65_v31 = vld [vmem:[#allocation2] sm:$0x1] }
  0x52   :  { %v67_v32 = vsel %vm66_vm3, %v65_v31, 0.0 }
  0x53   :  { %68 = vadd.xlane.f32.xlu0 %v67_v32 }
  0xdc   :  { %v69_v33 = vpop.xlane.xlu0 %68 }
  0xdd   :  { %v70_v34 = vrot.slane %v69_v33, 4 }
  0xdf   :  { %v71_v35 = vadd.f32 %v70_v34, %v69_v33 }
  0xe1   :  { %v72_v36 = vrot.slane %v71_v35, 2 }
  0xe3   :  { %v73_v37 = vadd.f32 %v72_v36, %v71_v35 }
  0xe5   :  { %v74_v38 = vrot.slane %v73_v37, 1 }
  0xe7   :  { %v75_v39 = vadd.f32 %v74_v38, %v73_v37 }
  0xe9   :  { %99 = vpush %v75_v39 }
 0x11a   :  { %s100_s0 = spop %99 }
 0x11b   :  { %v77_v40 = vstv %s100_s0 }
 0x11c   :  { %v98_v41 = vadd.f32 -3.1622778e-05, %v77_v40 }
 0x11e   :  { %v80_v42 = vmul.f32 0.035714287, %v98_v41 }
 0x120   :  { %82 = vst.msk [vmem:[#allocation6] sm:$0x1] %vm81_vm4, %v80_v42 }
 0x121   :  { %139 = shalt.err (!%p136_p9)
}
 0x122   :  { %92 = dma.vmem_to_hbm [thread:$0]  %s90_s14, 16, %s174_s1, [#allocation5]  }
 0x123   :  { %150 = dma.done.wait [#allocation5], 16  }
 0x124   :  { %151 = vsyncadd [#allocation5], 4294967280 }
 0x125   :  { %96 = vsyncpa [#allocation4], 1 }
 0x126   :  { %97 = vsyncpa [#allocation5], 1 }

</bundles_post_ra>
